<compile_context>
chip_gen: v7x
topology: tpu7x:2x2x1
jax: 0.10.0
libtpu: 0.0.40
codegen_flags: <defaults>
</compile_context>

<pallas_src>
import functools

import jax
import jax.numpy as jnp
from jax.experimental import pallas as pl
from jax.experimental.pallas import tpu as pltpu

ACT_ENCDEC = "sigmoid"   # cfg.act_SAEencdec
ACT_REG = "sigmoid"      # cfg.act_SAEreg

LANE = 128
SUBLANE = 8
_MAX_TILE_ROWS = 1024          # review: 512->~85% of HBM roofline, >=1024 -> ~86%
_ROW_BYTES_BUDGET = 6 << 20    # VMEM budget for per-row activation/IO buffers


def _round_up(n, m):
    return ((n + m - 1) // m) * m


# --------------------------------- activations -----------------------------------


def _act_kernel(y, act):
    """In-kernel activation.  Sigmoid routed through the EUP (exp + approx recip)."""
    if act == "sigmoid":
        return pl.reciprocal(1.0 + jnp.exp(-y), approx=True)
    if act == "relu":
        return jnp.maximum(y, 0.0)
    if act == "tanh":
        return jnp.tanh(y)
    return y  # linear


def _act_ref(y, act):
    if act == "sigmoid":
        return jax.nn.sigmoid(y)
    if act == "relu":
        return jnp.maximum(y, 0.0)
    if act == "tanh":
        return jnp.tanh(y)
    return y


# --------------------------------- kernels ----------------------------------------


def _pad_lanes(h, pad):
    """Zero-pad the lane (last) dim of an in-VMEM activation block."""
    if pad == 0:
        return h
    z = jnp.zeros((h.shape[0], pad), h.dtype)
    return jnp.concatenate([h, z], axis=-1)


def _rep_kernel(x_ref, *refs, n_layers, act, in_pad):
    """Chained representation path: h_{i+1} = act(h_i @ W_i + b_i), all in VMEM."""
    out_ref = refs[-1]
    h = _pad_lanes(x_ref[...], in_pad)               # (TB, D0p) bf16
    a = None
    for i in range(n_layers):
        w = refs[2 * i][...]                         # (Dip, Dop) bf16, VMEM-resident
        b = refs[2 * i + 1][...]                     # (1,  Dop)  f32
        a = _act_kernel(jnp.dot(h, w, preferred_element_type=jnp.float32) + b, act)
        h = a.astype(jnp.bfloat16)                   # bf16 carry for the next MXU pass
    out_ref[...] = a[:, :out_ref.shape[-1]].astype(out_ref.dtype)


def _pretrain_kernel(x_ref, *refs, n_rep_layers, act_encdec, act_reg, x_dim,
                     emit_inputs, in_pad):
    """rep through blocks [0, NoL), then full block NoL with fused dec+reg head.

    refs = enc_w0, enc_b0, ..., enc_w_NoL, enc_b_NoL, head_w, head_b, *out_refs
    out_refs = (inputs_ref, head_ref) if emit_inputs else (head_ref,)
    """
    n_w = 2 * (n_rep_layers + 1) + 2
    out_refs = refs[n_w:]
    if emit_inputs:
        inputs_ref, head_ref = out_refs
    else:
        (head_ref,) = out_refs

    h = _pad_lanes(x_ref[...], in_pad)               # bf16
    a = None
    for i in range(n_rep_layers):
        w = refs[2 * i][...]
        b = refs[2 * i + 1][...]
        a = _act_kernel(jnp.dot(h, w, preferred_element_type=jnp.float32) + b,
                        act_encdec)
        h = a.astype(jnp.bfloat16)
    if emit_inputs:                                  # input to block NoL (true width)
        inputs_ref[...] = a[:, :inputs_ref.shape[-1]].astype(inputs_ref.dtype)

    # encoder of block NoL
    w = refs[2 * n_rep_layers][...]
    b = refs[2 * n_rep_layers + 1][...]
    hid = _act_kernel(jnp.dot(h, w, preferred_element_type=jnp.float32) + b,
                      act_encdec).astype(jnp.bfloat16)

    # fused decoder + regression head: one lane-dense matmul, one (true-width) store
    hw = refs[n_w - 2][...]
    hb = refs[n_w - 1][...]
    y = jnp.dot(hid, hw, preferred_element_type=jnp.float32) + hb
    if act_encdec == act_reg:
        y = _act_kernel(y, act_encdec)
    else:
        col = jax.lax.broadcasted_iota(jnp.int32, y.shape, 1)
        y = jnp.where(col < x_dim, _act_kernel(y, act_encdec), _act_kernel(y, act_reg))
    head_ref[...] = y[:, :head_ref.shape[-1]].astype(head_ref.dtype)


# ------------------- parameter construction (PyTorch-style init) ------------------


def _init_linear(key, din, dout):
    k_w, k_b = jax.random.split(key)
    bound = 1.0 / (din ** 0.5)
    w = jax.random.uniform(k_w, (din, dout), jnp.float32, -bound, bound)
    b = jax.random.uniform(k_b, (1, dout), jnp.float32, -bound, bound)
    return w, b


def init_qae(key, in_dim, hid_dim):
    k_e, k_d, k_r = jax.random.split(key, 3)
    return {"enc": _init_linear(k_e, in_dim, hid_dim),
            "dec": _init_linear(k_d, hid_dim, in_dim),
            "reg": _init_linear(k_r, hid_dim, 1)}


def init_stacked_qae(key, sae_size):
    keys = jax.random.split(key, len(sae_size) - 1)
    return [init_qae(keys[i], sae_size[i], sae_size[i + 1])
            for i in range(len(sae_size) - 1)]


def _pad2(x, rpad, cpad, dtype):
    r, c = x.shape
    return jnp.zeros((rpad, cpad), dtype).at[:r, :c].set(x.astype(dtype))


def prepare_kernel_params(raw_params, sae_size):
    """Array-only pytree (safe to pass as a jit argument).  Weights are zero-padded
    to (8,128)-aligned bf16 slabs; the dec+reg heads are pre-fused into one
    lane-dense slab.  Zero padding keeps the chained math exact."""
    layers = []
    for i, p in enumerate(raw_params):
        din, dhid = sae_size[i], sae_size[i + 1]
        din_p, dhid_p = _round_up(din, LANE), _round_up(dhid, LANE)
        head_p = _round_up(din + 1, LANE)
        ew, eb = p["enc"]
        dw, db = p["dec"]
        rw, rb = p["reg"]
        layers.append(dict(
            enc_w=_pad2(ew, din_p, dhid_p, jnp.bfloat16),
            enc_b=_pad2(eb, 1, dhid_p, jnp.float32),
            head_w=_pad2(jnp.concatenate([dw, rw], axis=1), dhid_p, head_p, jnp.bfloat16),
            head_b=_pad2(jnp.concatenate([db, rb], axis=1), 1, head_p, jnp.float32),
        ))
    return layers


# ------------------------------- tiling / VMEM budget ------------------------------


def _choose_batch_tile(B, row_bytes):
    b_pad = _round_up(max(B, SUBLANE), SUBLANE)
    max_rows = max(SUBLANE,
                   (_ROW_BYTES_BUDGET // max(row_bytes, 1)) // SUBLANE * SUBLANE)
    tb = min(b_pad, min(max_rows, _MAX_TILE_ROWS))
    # v7x: guarantee >= 2 grid steps so the "parallel" batch axis shards over 2 TCs.
    if tb == b_pad and b_pad >= 2 * SUBLANE:
        tb = _round_up((b_pad + 1) // 2, SUBLANE)
    b_pad = _round_up(b_pad, tb)
    return tb, b_pad


def _compiler_params(weight_bytes, tile_bytes):
    # weights (default double-buffered) + pipelined IO/activation tiles + headroom,
    # clamped to [32 MiB, 48 MiB] (>= scoped defaults, < v7x's 64 MiB physical VMEM).
    est = 2 * weight_bytes + 4 * tile_bytes + (8 << 20)
    vmem = int(min(max(est, 32 << 20), 48 << 20))
    return pltpu.CompilerParams(dimension_semantics=("parallel",),
                                vmem_limit_bytes=vmem)


def _pad_batch(X, b_pad):
    """bf16 input stream, feature dim left UNPADDED (block last dim == array dim)."""
    B, D = X.shape
    Xb = X.astype(jnp.bfloat16)
    if b_pad == B:
        return Xb
    return jnp.zeros((b_pad, D), jnp.bfloat16).at[:B, :].set(Xb)


def _nbytes(a):
    return a.size * a.dtype.itemsize


# ------------------------------- forward wrappers ----------------------------------


def _rep_forward(params, X, sae_size):
    n_layers = len(params)
    din0 = sae_size[0]
    d_out = sae_size[-1]
    din0_p = params[0]["enc_w"].shape[0]
    B = X.shape[0]

    row_bytes = 2 * 2 * din0 + 2 * 4 * d_out                     # 2x-buffered in/out rows
    row_bytes += sum(12 * p["enc_w"].shape[1] for p in params)   # f32 y/a + bf16 h temps
    tb, b_pad = _choose_batch_tile(B, row_bytes)

    Xp = _pad_batch(X, b_pad)

    in_specs = [pl.BlockSpec((tb, din0), lambda i: (i, 0))]
    args = [Xp]
    weight_bytes = 0
    for p in params:
        for name in ("enc_w", "enc_b"):
            w = p[name]
            in_specs.append(pl.BlockSpec(w.shape, lambda i: (0, 0)))
            args.append(w)
            weight_bytes += _nbytes(w)

    kernel = functools.partial(_rep_kernel, n_layers=n_layers, act=ACT_ENCDEC,
                               in_pad=din0_p - din0)
    out = pl.pallas_call(
        kernel,
        out_shape=jax.ShapeDtypeStruct((b_pad, d_out), jnp.float32),
        grid=(b_pad // tb,),
        in_specs=in_specs,
        out_specs=pl.BlockSpec((tb, d_out), lambda i: (i, 0)),
        compiler_params=_compiler_params(weight_bytes, tb * row_bytes),
    )(*args)
    return out[:B]


def _pretrain_forward(params, X, sae_size, NoL):
    B = X.shape[0]
    din0 = sae_size[0]
    din0_p = params[0]["enc_w"].shape[0]
    in_dim = sae_size[NoL]          # input dim of block NoL (== dec output dim)
    head_cols = in_dim + 1
    emit_inputs = NoL > 0

    row_bytes = 2 * 2 * din0 + 2 * 4 * head_cols
    if emit_inputs:
        row_bytes += 2 * 4 * in_dim
    row_bytes += sum(12 * params[li]["enc_w"].shape[1] for li in range(NoL + 1))
    row_bytes += 12 * params[NoL]["head_w"].shape[1]
    tb, b_pad = _choose_batch_tile(B, row_bytes)

    Xp = _pad_batch(X, b_pad)

    in_specs = [pl.BlockSpec((tb, din0), lambda i: (i, 0))]
    args = [Xp]
    weight_bytes = 0
    for li in range(NoL + 1):
        for name in ("enc_w", "enc_b"):
            w = params[li][name]
            in_specs.append(pl.BlockSpec(w.shape, lambda i: (0, 0)))
            args.append(w)
            weight_bytes += _nbytes(w)
    for name in ("head_w", "head_b"):
        w = params[NoL][name]
        in_specs.append(pl.BlockSpec(w.shape, lambda i: (0, 0)))
        args.append(w)
        weight_bytes += _nbytes(w)

    if emit_inputs:
        out_shape = (jax.ShapeDtypeStruct((b_pad, in_dim), jnp.float32),
                     jax.ShapeDtypeStruct((b_pad, head_cols), jnp.float32))
        out_specs = (pl.BlockSpec((tb, in_dim), lambda i: (i, 0)),
                     pl.BlockSpec((tb, head_cols), lambda i: (i, 0)))
    else:
        out_shape = jax.ShapeDtypeStruct((b_pad, head_cols), jnp.float32)
        out_specs = pl.BlockSpec((tb, head_cols), lambda i: (i, 0))

    kernel = functools.partial(
        _pretrain_kernel, n_rep_layers=NoL, act_encdec=ACT_ENCDEC, act_reg=ACT_REG,
        x_dim=in_dim, emit_inputs=emit_inputs, in_pad=din0_p - din0)

    outs = pl.pallas_call(
        kernel,
        out_shape=out_shape,
        grid=(b_pad // tb,),
        in_specs=in_specs,
        out_specs=out_specs,
        compiler_params=_compiler_params(weight_bytes, tb * row_bytes),
    )(*args)

    if emit_inputs:
        inputs_out, head_out = outs
        inputs = inputs_out[:B]
    else:
        head_out = outs
        inputs = X                   # PyTorch returns X itself when NoL == 0
    x_hat = head_out[:B, :in_dim]
    y_hat = head_out[:B, in_dim:in_dim + 1]
    return inputs, (x_hat, y_hat)


def stacked_qae_forward(params, X, sae_size, NoL, PreTrain=False):
    if PreTrain is True:
        return _pretrain_forward(params, X, sae_size, NoL)
    return _rep_forward(params, X, sae_size)


# ----------------------------- pure-JAX reference ----------------------------------


def _ref_qae(raw, x, rep=False):
    h = _act_ref(x @ raw["enc"][0] + raw["enc"][1], ACT_ENCDEC)
    if rep:
        return h
    x_hat = _act_ref(h @ raw["dec"][0] + raw["dec"][1], ACT_ENCDEC)
    y_hat = _act_ref(h @ raw["reg"][0] + raw["reg"][1], ACT_REG)
    return x_hat, y_hat


def _ref_stacked(raw_params, X, NoL, PreTrain=False):
    out = X
    if PreTrain is True:
        if NoL == 0:
            return out, _ref_qae(raw_params[0], out)
        for i in range(NoL):
            out = _ref_qae(raw_params[i], out, rep=True)
        return out, _ref_qae(raw_params[NoL], out)
    for i in range(len(raw_params)):
        out = _ref_qae(raw_params[i], out, rep=True)
    return out


# --------------------------------- demo --------------------------------------------


if __name__ == "__main__":
    key = jax.random.PRNGKey(0)
    k_x, k_p = jax.random.split(key)

    sae_size = (16, 32, 8)          # cfg.SAE_size -> two QualityAutoEncoder blocks
    batch = 8
    X = jax.random.normal(k_x, (batch, sae_size[0]), dtype=jnp.float32)

    raw_params = init_stacked_qae(k_p, sae_size)
    kparams = prepare_kernel_params(raw_params, sae_size)

    # Params are jit ARGUMENTS (array pytree) -> weight updates don't retrace.
    fwd = jax.jit(stacked_qae_forward,
                  static_argnames=("sae_size", "NoL", "PreTrain"))

    # Supervised / fine-tune path (PreTrain=False): stacked representations.
    rep = jax.block_until_ready(
        fwd(kparams, X, sae_size=sae_size, NoL=0, PreTrain=False))
    assert rep.shape == (batch, sae_size[-1])
    rep_ref = _ref_stacked(raw_params, X, NoL=0, PreTrain=False)
    assert jnp.allclose(rep, rep_ref, atol=3e-2, rtol=3e-2)

    # Unsupervised pre-training path (PreTrain=True, NoL=1).
    inputs, (x_hat, y_hat) = fwd(kparams, X, sae_size=sae_size, NoL=1, PreTrain=True)
    inputs = jax.block_until_ready(inputs)
    x_hat = jax.block_until_ready(x_hat)
    y_hat = jax.block_until_ready(y_hat)
    assert inputs.shape == (batch, sae_size[1])
    assert x_hat.shape == (batch, sae_size[1])
    assert y_hat.shape == (batch, 1)
    inp_ref, (xh_ref, yh_ref) = _ref_stacked(raw_params, X, NoL=1, PreTrain=True)
    assert jnp.allclose(inputs, inp_ref, atol=3e-2, rtol=3e-2)
    assert jnp.allclose(x_hat, xh_ref, atol=3e-2, rtol=3e-2)
    assert jnp.allclose(y_hat, yh_ref, atol=3e-2, rtol=3e-2)

    # Unsupervised pre-training path (PreTrain=True, NoL=0): inputs is X itself,
    # and the dead `inputs` writeback is elided from the kernel.
    inputs0, (x_hat0, y_hat0) = fwd(kparams, X, sae_size=sae_size, NoL=0, PreTrain=True)
    x_hat0 = jax.block_until_ready(x_hat0)
    y_hat0 = jax.block_until_ready(y_hat0)
    assert inputs0.shape == (batch, sae_size[0])
    assert x_hat0.shape == (batch, sae_size[0])
    assert y_hat0.shape == (batch, 1)
    inp0_ref, (xh0_ref, yh0_ref) = _ref_stacked(raw_params, X, NoL=0, PreTrain=True)
    assert jnp.allclose(inputs0, inp0_ref, atol=3e-2, rtol=3e-2)
    assert jnp.allclose(x_hat0, xh0_ref, atol=3e-2, rtol=3e-2)
    assert jnp.allclose(y_hat0, yh0_ref, atol=3e-2, rtol=3e-2)

    print("KERNEL_OK")
</pallas_src>

<mosaic_0001>
module attributes {stable_mosaic.version = 11 : i64} {
  func.func @_rep_kernel(%arg0: i32, %arg1: memref<8x16xbf16, #tpu.memory_space<vmem>>, %arg2: memref<128x128xbf16, #tpu.memory_space<vmem>>, %arg3: memref<1x128xf32, #tpu.memory_space<vmem>>, %arg4: memref<128x128xbf16, #tpu.memory_space<vmem>>, %arg5: memref<1x128xf32, #tpu.memory_space<vmem>>, %arg6: memref<8x8xf32, #tpu.memory_space<vmem>>) attributes {dimension_semantics = [#tpu.dimension_semantics<parallel>], iteration_bounds = array<i64: 1>, scalar_prefetch = 0 : i64, scratch_operands = 0 : i64, tpu.core_type = #tpu.core_type<tc>, window_params = [{transform_indices = @transform_0, window_bounds = array<i64: 8, 16>}, {pipeline_mode = #tpu.pipeline_mode<synchronous>, transform_indices = @transform_1, window_bounds = array<i64: 128, 128>}, {pipeline_mode = #tpu.pipeline_mode<synchronous>, transform_indices = @transform_2, window_bounds = array<i64: 1, 128>}, {pipeline_mode = #tpu.pipeline_mode<synchronous>, transform_indices = @transform_3, window_bounds = array<i64: 128, 128>}, {pipeline_mode = #tpu.pipeline_mode<synchronous>, transform_indices = @transform_4, window_bounds = array<i64: 1, 128>}, {transform_indices = @transform_5, window_bounds = array<i64: 8, 8>}]} {
    %c0 = arith.constant 0 : index
    %c0_0 = arith.constant 0 : index
    %0 = vector.load %arg1[%c0, %c0_0] : memref<8x16xbf16, #tpu.memory_space<vmem>>, vector<8x16xbf16>
    %cst = arith.constant 0.000000e+00 : bf16
    %1 = vector.broadcast %cst : bf16 to vector<8x112xbf16>
    %2 = tpu.concatenate %0, %1 in 1 : vector<8x16xbf16>, vector<8x112xbf16> -> vector<8x128xbf16>
    %c0_1 = arith.constant 0 : index
    %c0_2 = arith.constant 0 : index
    %3 = vector.load %arg2[%c0_1, %c0_2] : memref<128x128xbf16, #tpu.memory_space<vmem>>, vector<128x128xbf16>
    %c0_3 = arith.constant 0 : index
    %c0_4 = arith.constant 0 : index
    %4 = vector.load %arg3[%c0_3, %c0_4] : memref<1x128xf32, #tpu.memory_space<vmem>>, vector<1x128xf32>
    %cst_5 = arith.constant dense<0.000000e+00> : vector<8x128xf32>
    %5 = tpu.matmul %2, %3, %cst_5 {dimension_numbers = #tpu.dot_dimension_numbers<[1], [0], [0], [1], [0, 0, 1, 1], [], []>} : vector<8x128xbf16>, vector<128x128xbf16>, vector<8x128xf32> -> vector<8x128xf32>
    %6 = vector.broadcast %4 : vector<1x128xf32> to vector<8x128xf32>
    %7 = arith.addf %5, %6 : vector<8x128xf32>
    %cst_6 = arith.constant 0.000000e+00 : f32
    %8 = vector.broadcast %cst_6 : f32 to vector<8x128xf32>
    %9 = arith.subf %8, %7 : vector<8x128xf32>
    %10 = math.exp %9 : vector<8x128xf32>
    %cst_7 = arith.constant 1.000000e+00 : f32
    %11 = vector.broadcast %cst_7 : f32 to vector<8x128xf32>
    %12 = arith.addf %11, %10 : vector<8x128xf32>
    %13 = tpu.reciprocal %12 {approx = true} : vector<8x128xf32> -> vector<8x128xf32>
    %14 = arith.truncf %13 : vector<8x128xf32> to vector<8x128xbf16>
    %c0_8 = arith.constant 0 : index
    %c0_9 = arith.constant 0 : index
    %15 = vector.load %arg4[%c0_8, %c0_9] : memref<128x128xbf16, #tpu.memory_space<vmem>>, vector<128x128xbf16>
    %c0_10 = arith.constant 0 : index
    %c0_11 = arith.constant 0 : index
    %16 = vector.load %arg5[%c0_10, %c0_11] : memref<1x128xf32, #tpu.memory_space<vmem>>, vector<1x128xf32>
    %cst_12 = arith.constant dense<0.000000e+00> : vector<8x128xf32>
    %17 = tpu.matmul %14, %15, %cst_12 {dimension_numbers = #tpu.dot_dimension_numbers<[1], [0], [0], [1], [0, 0, 1, 1], [], []>} : vector<8x128xbf16>, vector<128x128xbf16>, vector<8x128xf32> -> vector<8x128xf32>
    %18 = vector.broadcast %16 : vector<1x128xf32> to vector<8x128xf32>
    %19 = arith.addf %17, %18 : vector<8x128xf32>
    %cst_13 = arith.constant 0.000000e+00 : f32
    %20 = vector.broadcast %cst_13 : f32 to vector<8x128xf32>
    %21 = arith.subf %20, %19 : vector<8x128xf32>
    %22 = math.exp %21 : vector<8x128xf32>
    %cst_14 = arith.constant 1.000000e+00 : f32
    %23 = vector.broadcast %cst_14 : f32 to vector<8x128xf32>
    %24 = arith.addf %23, %22 : vector<8x128xf32>
    %25 = tpu.reciprocal %24 {approx = true} : vector<8x128xf32> -> vector<8x128xf32>
    %26 = vector.extract_strided_slice %25 {offsets = [0, 0], sizes = [8, 8], strides = [1, 1]} : vector<8x128xf32> to vector<8x8xf32>
    %c0_15 = arith.constant 0 : index
    %c0_16 = arith.constant 0 : index
    %27 = vector.load %arg6[%c0_15, %c0_16] : memref<8x8xf32, #tpu.memory_space<vmem>>, vector<8x8xf32>
    tpu.vector_store %arg6[%c0_15, %c0_16], %26 {strides = array<i32>} : memref<8x8xf32, #tpu.memory_space<vmem>>, vector<8x8xf32>,
    return
  }
  func.func @transform_0(%arg0: i32) -> (i32, i32) {
    %c0_i32 = arith.constant 0 : i32
    %c0_i32_0 = arith.constant 0 : i32
    return %arg0, %c0_i32 : i32, i32
  }
  func.func @transform_1(%arg0: i32) -> (i32, i32) {
    %c0_i32 = arith.constant 0 : i32
    %c0_i32_0 = arith.constant 0 : i32
    %c0_i32_1 = arith.constant 0 : i32
    return %c0_i32, %c0_i32_0 : i32, i32
  }
  func.func @transform_2(%arg0: i32) -> (i32, i32) {
    %c0_i32 = arith.constant 0 : i32
    %c0_i32_0 = arith.constant 0 : i32
    %c0_i32_1 = arith.constant 0 : i32
    return %c0_i32, %c0_i32_0 : i32, i32
  }
  func.func @transform_3(%arg0: i32) -> (i32, i32) {
    %c0_i32 = arith.constant 0 : i32
    %c0_i32_0 = arith.constant 0 : i32
    %c0_i32_1 = arith.constant 0 : i32
    return %c0_i32, %c0_i32_0 : i32, i32
  }
  func.func @transform_4(%arg0: i32) -> (i32, i32) {
    %c0_i32 = arith.constant 0 : i32
    %c0_i32_0 = arith.constant 0 : i32
    %c0_i32_1 = arith.constant 0 : i32
    return %c0_i32, %c0_i32_0 : i32, i32
  }
  func.func @transform_5(%arg0: i32) -> (i32, i32) {
    %c0_i32 = arith.constant 0 : i32
    %c0_i32_0 = arith.constant 0 : i32
    return %arg0, %c0_i32 : i32, i32
  }
}

</mosaic_0001>

<bundles_post_ra>
// kernel: stacked_qae_forward.1
= control target key start
LH: loop header
LB: loop body
LE: loop exit
PB: predicated region body
PF: predicated region fallthrough
CT: control target
= control target key end

     0   :  { %10 = vsyncpa [#allocation3], 0  ;;  %s569_s0 = inlined_call_operand.vmem [shape: bf16[8,16], index: 0, kind: input, shape index: {}]   ;;  %s570_s1 = inlined_call_operand.hbm [shape: bf16[128,128], index: 1, kind: input, shape index: {}]   ;;  %s571_s2 = inlined_call_operand.vmem [shape: f32[1,128], index: 2, kind: input, shape index: {}]   ;;  %s572_s3 = inlined_call_operand.hbm [shape: bf16[128,128], index: 3, kind: input, shape index: {}]   ;;  %s573_s4 = inlined_call_operand.vmem [shape: f32[1,128], index: 4, kind: input, shape index: {}]   ;;  %s574_s5 = inlined_call_operand.hbm [shape: f32[8,8], index: 5, kind: output, shape index: {}]  }
   0x1   :  { %11 = vsyncpa [#allocation6], 0 }
   0x2   :  { %12 = vsyncpa [#allocation4], 0  ;;  %s487_s18 = smov [#allocation2]   ;;  %s415_s22 = scalar_lea.hbm %s570_s1, 1024 }
   0x3   :  { %s20_s19 = sshll.u32 %s487_s18, 4  ;;  %p416_p0 = scmp.ne.s32.totalorder %s570_s1, %s415_s22  ;;  %s21_s19 = int_to_ptr.vmem [resolvable:$true] %s20_s19 }
   0x4   :  { %p419_p1 = scmp.lt.u32.totalorder %s415_s22, %s570_s1 }
   0x6   :  { %p421_p2 = pnand %p419_p1, %p416_p0 }
   0x8   :  { %424 = shalt.err (!%p421_p2)
}
   0x9   :  { %s425_s27 = scalar_lea.vmem %s21_s19, 1024  ;;  %p430_p4 = scmp.lt.s32.totalorder %s21_s19, %s21_s19 }
   0xa   :  { %p426_p3 = scmp.ne.s32.totalorder %s21_s19, %s425_s27  ;;  %p431_p5 = scmp.lt.s32.totalorder %s425_s27, %s425_s27 }
   0xc   :  { %p432_p6 = por %p431_p5, %p430_p4 }
   0xe   :  { %p433_p7 = pnand %p432_p6, %p426_p3 }
  0x10   :  { %436 = shalt.err (!%p433_p7)
}
  0x11   :  { %s488_s28 = smov 64   ;;  %s489_s29 = smov 4  }
  0x12   :  { %26 = dma.hbm_to_vmem [thread:$0]  %s570_s1, 1024, %s21_s19, [#allocation3], %s488_s28, %s488_s28, %s489_s29  }
  0x13   :  { %s490_s7 = smov [#allocation5]   ;;  %s437_s11 = scalar_lea.hbm %s572_s3, 1024 }
  0x14   :  { %s34_s8 = sshll.u32 %s490_s7, 4  ;;  %p438_p8 = scmp.ne.s32.totalorder %s572_s3, %s437_s11  ;;  %s35_s8 = int_to_ptr.vmem [resolvable:$true] %s34_s8 }
  0x15   :  { %p441_p9 = scmp.lt.u32.totalorder %s437_s11, %s572_s3 }
  0x17   :  { %p443_p10 = pnand %p441_p9, %p438_p8 }
  0x19   :  { %446 = shalt.err (!%p443_p10)
}
  0x1a   :  { %s447_s16 = scalar_lea.vmem %s35_s8, 1024  ;;  %p452_p12 = scmp.lt.s32.totalorder %s35_s8, %s35_s8 }
  0x1b   :  { %p448_p11 = scmp.ne.s32.totalorder %s35_s8, %s447_s16  ;;  %p453_p13 = scmp.lt.s32.totalorder %s447_s16, %s447_s16 }
  0x1d   :  { %p454_p0 = por %p453_p13, %p452_p12 }
  0x1f   :  { %p455_p1 = pnand %p454_p0, %p448_p11 }
  0x21   :  { %458 = shalt.err (!%p455_p1)
}
  0x22   :  { %40 = dma.hbm_to_vmem [thread:$0]  %s572_s3, 1024, %s35_s8, [#allocation6], %s488_s28, %s488_s28, %s489_s29  }
  0x23   :  { %481 = dma.done.wait [#allocation3], 1024  }
  0x24   :  { %482 = vsyncadd [#allocation3], 4294966272 }
  0x25   :  { %483 = dma.done.wait [#allocation6], 1024  }
  0x26   :  { %484 = vsyncadd [#allocation6], 4294966272  ;;  %v491_v0 = vmov 0.0   ;;  %vm492_vm0 = vmmov 0   ;;  %v391_v1 = vld [vmem:[#allocation2] sm:$0xff]   ;;  %v392_v2 = vld [vmem:[#allocation2 + $0x8] sm:$0xff]  }
  0x27   :  { %344 = vmatprep.subr.bf16.mxu0 %v491_v0  ;;  %360 = vmatprep.mubr.msk.bf16.mxu0 %vm492_vm0, %v491_v0  ;;  %v393_v3 = vld [vmem:[#allocation2 + $0x10] sm:$0xff]   ;;  %v394_v4 = vld [vmem:[#allocation2 + $0x18] sm:$0xff]   ;;  %v395_v5 = vld [vmem:[#allocation2 + $0x20] sm:$0xff]   ;;  %vm51_vm1 = vcmask 130048   ;;  %vm289_vm2 = vcmask 64512  }
  0x28   :  { %364 = vmatprep.subr.bf16.mxu1 %v491_v0  ;;  %380 = vmatprep.mubr.msk.bf16.mxu1 %vm492_vm0, %v491_v0  ;;  %v396_v6 = vld [vmem:[#allocation2 + $0x28] sm:$0xff]   ;;  %v397_v7 = vld [vmem:[#allocation2 + $0x30] sm:$0xff]   ;;  %v398_v8 = vld [vmem:[#allocation2 + $0x38] sm:$0xff]  }
  0x29   :  { %345 = vmatpush3.bf16.msra.mxu0 %v391_v1  ;;  %v50_v9 = vld [vmem:[%s569_s0] sm:$0xf]  ;;  %v400_v11 = vld [vmem:[#allocation5 + $0x8] sm:$0xff]   ;;  %v401_v12 = vld [vmem:[#allocation5 + $0x10] sm:$0xff]  }
  0x2a   :  { %346 = vmatprep.subr.bf16.mxu0 %v491_v0  ;;  %v399_v10 = vld [vmem:[#allocation5] sm:$0xff]   ;;  %v402_v13 = vld [vmem:[#allocation5 + $0x18] sm:$0xff]   ;;  %v404_v15 = vld [vmem:[#allocation5 + $0x28] sm:$0xff]  }
  0x2b   :  { %365 = vmatpush3.bf16.msra.mxu1 %v399_v10  ;;  %v403_v14 = vld [vmem:[#allocation5 + $0x20] sm:$0xff]   ;;  %v405_v16 = vld [vmem:[#allocation5 + $0x30] sm:$0xff]   ;;  %v406_v17 = vld [vmem:[#allocation5 + $0x38] sm:$0xff]  }
  0x2c   :  { %366 = vmatprep.subr.bf16.mxu1 %v491_v0  ;;  %v307_v18 = vld [vmem:[%s571_s2] ss:$0 sm:$0xff]  ;;  %s493_s2 = smov [#allocation7]  }
  0x2d   :  { %347 = vmatpush3.bf16.msra.mxu0 %v392_v2  ;;  %v317_v30 = vld [vmem:[%s573_s4] ss:$0 sm:$0xff]  ;;  %s297_s22 = sshll.u32 %s493_s2, 4  ;;  %s298_s22 = int_to_ptr.vmem [resolvable:$true] %s297_s22 }
  0x2e   :  { %348 = vmatprep.subr.bf16.mxu0 %v491_v0  ;;  %s459_s23 = scalar_lea.vmem %s298_s22, 128  ;;  %p464_p3 = scmp.lt.s32.totalorder %s298_s22, %s298_s22 }
  0x2f   :  { %367 = vmatpush3.bf16.msra.mxu1 %v400_v11  ;;  %p460_p2 = scmp.ne.s32.totalorder %s298_s22, %s459_s23  ;;  %p465_p4 = scmp.lt.s32.totalorder %s459_s23, %s459_s23 }
  0x30   :  { %368 = vmatprep.subr.bf16.mxu1 %v491_v0 }
  0x31   :  { %349 = vmatpush3.bf16.msra.mxu0 %v393_v3  ;;  %p466_p5 = por %p465_p4, %p464_p3 }
  0x32   :  { %350 = vmatprep.subr.bf16.mxu0 %v491_v0 }
  0x33   :  { %369 = vmatpush3.bf16.msra.mxu1 %v401_v12  ;;  %p467_p6 = pnand %p466_p5, %p460_p2 }
  0x34   :  { %370 = vmatprep.subr.bf16.mxu1 %v491_v0 }
  0x35   :  { %351 = vmatpush3.bf16.msra.mxu0 %v394_v4 }
  0x36   :  { %352 = vmatprep.subr.bf16.mxu0 %v491_v0 }
  0x37   :  { %371 = vmatpush3.bf16.msra.mxu1 %v402_v13 }
  0x38   :  { %372 = vmatprep.subr.bf16.mxu1 %v491_v0 }
  0x39   :  { %353 = vmatpush3.bf16.msra.mxu0 %v395_v5 }
  0x3a   :  { %354 = vmatprep.subr.bf16.mxu0 %v491_v0 }
  0x3b   :  { %373 = vmatpush3.bf16.msra.mxu1 %v403_v14 }
  0x3c   :  { %374 = vmatprep.subr.bf16.mxu1 %v491_v0 }
  0x3d   :  { %355 = vmatpush3.bf16.msra.mxu0 %v396_v6 }
  0x3e   :  { %356 = vmatprep.subr.bf16.mxu0 %v491_v0 }
  0x3f   :  { %375 = vmatpush3.bf16.msra.mxu1 %v404_v15 }
  0x40   :  { %376 = vmatprep.subr.bf16.mxu1 %v491_v0 }
  0x41   :  { %357 = vmatpush3.bf16.msra.mxu0 %v397_v7 }
  0x42   :  { %358 = vmatprep.subr.bf16.mxu0 %v491_v0 }
  0x43   :  { %377 = vmatpush3.bf16.msra.mxu1 %v405_v16 }
  0x44   :  { %378 = vmatprep.subr.bf16.mxu1 %v491_v0 }
  0x45   :  { %359 = vmatpush3.bf16.msra.mxu0 %v398_v8 }
  0x47   :  { %379 = vmatpush3.bf16.msra.mxu1 %v406_v17 }
  0x48   :  { %361 = vmatmul.mubr.msk.bf16.vlgmr.msra.gmra.mrb[0].mxu0 %vm51_vm1, %v50_v9 }
 0x11b   :  { %v161_v19 = vpop.f32.mrb[0].mxu0 }
 0x11c   :  { %v162_v20 = vadd.f32 %v307_v18, %v161_v19  ;;  %v362_v21 = vpop.f32.mrb[1].mxu0 }
 0x11d   :  { %v164_v22 = vpop.f32.mrb[2].mxu0 }
 0x11e   :  { %v167_v23 = vsub.f32 0.0, %v162_v20  ;;  %v363_v24 = vpop.f32.mrb[3].mxu0 }
 0x120   :  { %v168_v25 = vmul.f32 1.442695, %v167_v23 }
 0x122   :  { %407 = vpow2.f32 %v168_v25 }
 0x12c   :  { %v408_v26 = vpop.eup %407 }
 0x12d   :  { %v170_v27 = vadd.f32 1.0, %v408_v26 }
 0x12f   :  { %409 = vrcp.f32 %v170_v27 }
 0x139   :  { %v410_v28 = vpop.eup %409 }
 0x13a   :  { %v172_v29 = vpack.c.bf16 %v410_v28, %v410_v28 }
 0x13c   :  { %381 = vmatmul.mubr.bf16.vlgmr.msra.gmra.mrb[0].mxu1 %v172_v29 }
 0x20f   :  { %v278_v31 = vpop.f32.mrb[0].mxu1 }
 0x210   :  { %v279_v32 = vadd.f32 %v317_v30, %v278_v31  ;;  %v382_v33 = vpop.f32.mrb[1].mxu1 }
 0x211   :  { %v281_v34 = vpop.f32.mrb[2].mxu1 }
 0x212   :  { %v284_v35 = vsub.f32 0.0, %v279_v32  ;;  %v383_v36 = vpop.f32.mrb[3].mxu1 }
 0x214   :  { %v285_v37 = vmul.f32 1.442695, %v284_v35 }
 0x216   :  { %411 = vpow2.f32 %v285_v37 }
 0x220   :  { %v412_v38 = vpop.eup %411 }
 0x221   :  { %v287_v39 = vadd.f32 1.0, %v412_v38 }
 0x223   :  { %413 = vrcp.f32 %v287_v39 }
 0x22d   :  { %v414_v40 = vpop.eup %413 }
 0x22e   :  { %290 = vst.msk [vmem:[#allocation7] sm:$0xff] %vm289_vm2, %v414_v40 }
 0x22f   :  { %470 = shalt.err (!%p467_p6)
}
 0x230   :  { %s471_s25 = scalar_lea.hbm %s574_s5, 128 }
 0x231   :  { %p472_p7 = scmp.ne.s32.totalorder %s574_s5, %s471_s25  ;;  %p475_p8 = scmp.lt.u32.totalorder %s471_s25, %s574_s5 }
 0x233   :  { %p477_p9 = pnand %p475_p8, %p472_p7 }
 0x235   :  { %480 = shalt.err (!%p477_p9)
}
 0x236   :  { %300 = dma.vmem_to_hbm [thread:$0]  %s298_s22, 128, %s574_s5, [#allocation4]  }
 0x237   :  { %485 = dma.done.wait [#allocation4], 128  }
 0x238   :  { %486 = vsyncadd [#allocation4], 4294967168 }
 0x239   :  { %304 = vsyncpa [#allocation3], 1 }
 0x23a   :  { %305 = vsyncpa [#allocation6], 1 }
 0x23b   :  { %306 = vsyncpa [#allocation4], 1 }

</bundles_post_ra>
